<compile_context>
chip_gen: v7x
topology: tpu7x:2x2x1
jax: 0.10.0
libtpu: 0.0.40
codegen_flags: <defaults>
</compile_context>

<pallas_src>
import math

import jax
import jax.numpy as jnp
import numpy as np
from jax.experimental import pallas as pl
from jax.experimental.pallas import tpu as pltpu

LANES = 128


# ----------------------------------------------------------------------------
# Kernel
# ----------------------------------------------------------------------------
def logsqrt2_quant_kernel(s_ref, x_ref, o_ref):
    """Elementwise log-sqrt(2) quant/dequant of an attention-map tile."""
    s = s_ref[0]                      # scalar scale, lives in SMEM
    inv_s = 1.0 / s                   # scalar reciprocal, once per tile

    x = x_ref[...].astype(jnp.float32)

    # x_int = round(x / s_x) + int_bias ; int_bias == 1 in the reference.
    x_int = jnp.round(x * inv_s) + 1.0            # integer-valued f32, >= 1

    # int_log_quant_10x / int_log_dequant_10x, fused and bit-exact:
    # for a positive integer v held exactly in f32,
    #   floor(log2(v))          == (float exponent bits) - 127
    #   "mantissa >= 1.5" bit   == top mantissa bit
    bits = pltpu.bitcast(x_int, jnp.int32)
    frac = ((bits >> 22) & 1).astype(jnp.float32)            # log-sqrt2 half step
    pow2 = pltpu.bitcast((bits >> 23) << 23, jnp.float32)    # 2 ** floor(log2(v))

    # dequant: floor(2^k + frac * 2^(k-1)), then reference post-processing.
    dq = jnp.floor(pow2 + frac * (pow2 * 0.5))
    dq = dq - 1.0                                  # subtract int_bias
    # '// 255' of a non-negative integer-valued float; keep a true divide so
    # exact multiples of 255 floor correctly (reciprocal-multiply can under-round).
    dq = jnp.floor(dq / 255.0)
    out = jnp.clip(dq, 0.0, 255.0) * 255.0

    o_ref[...] = (out * s).astype(o_ref.dtype)


# ----------------------------------------------------------------------------
# pallas_call wrapper
# ----------------------------------------------------------------------------
def _logsqrt2_pallas(x2d, s_arr, block_rows):
    rows, cols = x2d.shape
    return pl.pallas_call(
        logsqrt2_quant_kernel,
        out_shape=jax.ShapeDtypeStruct((rows, cols), x2d.dtype),
        grid_spec=pltpu.PrefetchScalarGridSpec(
            num_scalar_prefetch=0,
            grid=(rows // block_rows,),
            in_specs=[
                pl.BlockSpec(memory_space=pltpu.MemorySpace.SMEM),   # s_x scalar
                pl.BlockSpec((block_rows, cols), lambda i: (i, 0)),  # x tile
            ],
            out_specs=pl.BlockSpec((block_rows, cols), lambda i: (i, 0)),
        ),
        compiler_params=pltpu.CompilerParams(
            dimension_semantics=("parallel",),
        ),
    )(s_arr, x2d)


class LogSqrt2Quantizer:
    """JAX/Pallas port of the PyTorch LogSqrt2Quantizer (forward pass only)."""

    def __init__(self, args_any):
        self.do_quant = True
        if args_any == {}:
            return
        self.bit_width = args_any.get("act_quant_bit_width")
        if self.bit_width != 4:
            raise ValueError("Now only support 4bit")
        self.n_levels = 2 ** self.bit_width
        self.inited = False
        self.int_bias = None
        self.base = None
        self.pre_bits = None
        print(f"Int log_sqrt_2 quantizer | output bit : {self.bit_width}")

    def __call__(self, x_hat, s_x, *, block_rows=512, lane_cols=512):
        if not self.do_quant:
            return x_hat, s_x
        s_val = float(s_x)
        if s_val == 0.0:
            # "when other's non quantize" -> pass through
            return x_hat, s_x

        if not self.inited:
            self.pre_bits = -math.log2(s_val)
            self.base = 2
            self.int_bias = 1           # fixed to 1, matching the reference
            self.inited = True

        orig_shape = x_hat.shape
        n = x_hat.size

        # Lane-dense repack: flatten to (rows, cols) with cols a multiple of
        # 128 so stores are full-lane, and tile rows in big blocks (~1 MiB).
        cols = lane_cols
        while cols > LANES and n < cols:
            cols //= 2
        rows = -(-n // cols)
        br = min(block_rows, rows)
        rows_p = -(-rows // br) * br
        pad = rows_p * cols - n

        flat = x_hat.reshape(-1)
        if pad:
            flat = jnp.pad(flat, (0, pad))   # padded tail is junk, sliced off below
        x2d = flat.reshape(rows_p, cols)
        s_arr = jnp.asarray([s_val], dtype=jnp.float32)

        out2d = _logsqrt2_pallas(x2d, s_arr, br)
        out = out2d.reshape(-1)[:n].reshape(orig_shape)
        # TODO(synk): round_ste backward (straight-through estimator) is not
        # implemented; forward-only port.
        return out, s_x


# ----------------------------------------------------------------------------
# NumPy mirror of the PyTorch forward, used only for the parity check below.
# ----------------------------------------------------------------------------
def _reference_numpy(x, s):
    x = np.asarray(x, dtype=np.float64)
    x_int = np.rint(x / s)
    x_int = np.rint(x_int + 1.0).astype(np.int64)

    # int_log_quant_10x (16-step shift loop, exactly as in the reference)
    log2_int = np.full_like(x_int, -1)
    tmp = x_int.copy()
    for i in range(15, -1, -1):
        ge = (tmp >= (1 << i)).astype(np.int64)
        log2_int += ge
        tmp = tmp >> ge
    rem2 = np.left_shift(x_int - np.left_shift(1, log2_int), 1)
    frac_add = (rem2 >= np.left_shift(1, log2_int)).astype(np.int64) * 5
    y = -(log2_int * 10 + frac_add)

    # int_log_dequant_10x
    ypos = -y
    int_part = ypos // 10
    frac_part = (ypos % 10) / 5.0
    dq = np.floor(2.0 ** int_part + frac_part * 2.0 ** (int_part - 1))

    dq = dq - 1.0
    dq = np.floor(dq / 255.0)
    out = np.clip(dq, 0.0, 255.0) * 255.0
    return (out * s).astype(np.float32)


# ----------------------------------------------------------------------------
# Main
# ----------------------------------------------------------------------------
if __name__ == "__main__":
    key = jax.random.PRNGKey(0)

    # Attention-map-like input (B, H, Sq, Sk): integer-quantized softmax
    # probabilities in [0, 1] with a per-tensor scale s_x.
    B, H, Sq, Sk = 2, 4, 16, 16
    s_x = 2.0 ** -15

    codes = jax.random.randint(key, (B, H, Sq, Sk), minval=0, maxval=2 ** 15 + 1)
    x_hat = codes.astype(jnp.float32) * jnp.float32(s_x)     # exactly in [0, 1]
    assert float(jnp.min(x_hat)) >= 0.0 and float(jnp.max(x_hat)) <= 1.0

    quant = LogSqrt2Quantizer({"act_quant_bit_width": 4})
    out, s_out = quant(x_hat, s_x)
    out = jax.block_until_ready(out)

    # --- sanity / parity checks (mirror the reference's runtime asserts) ---
    assert out.shape == x_hat.shape
    assert float(s_out) == s_x
    levels = np.unique(np.asarray(out) / (255.0 * s_x))      # the pre-*255 codes
    assert levels.min() >= 0.0 and levels.max() <= 255.0
    assert levels.size <= quant.n_levels, levels

    ref = _reference_numpy(np.asarray(x_hat), s_x)
    np.testing.assert_allclose(np.asarray(out), ref, rtol=1e-6, atol=1e-6)

    # pass-through branches of the module
    q_off = LogSqrt2Quantizer({"act_quant_bit_width": 4})
    q_off.do_quant = False
    out_off, _ = q_off(x_hat, s_x)
    assert out_off is x_hat

    out_zero, s_zero = quant(x_hat, 0.0)
    assert out_zero is x_hat and s_zero == 0.0

    print("KERNEL_OK")
</pallas_src>

<mosaic_0001>
module attributes {stable_mosaic.version = 11 : i64} {
  func.func @logsqrt2_quant_kernel(%arg0: i32, %arg1: memref<1xf32, #tpu.memory_space<smem>>, %arg2: memref<4x512xf32, #tpu.memory_space<vmem>>, %arg3: memref<4x512xf32, #tpu.memory_space<vmem>>) attributes {dimension_semantics = [#tpu.dimension_semantics<parallel>], iteration_bounds = array<i64: 1>, scalar_prefetch = 0 : i64, scratch_operands = 0 : i64, tpu.core_type = #tpu.core_type<tc>, window_params = [{transform_indices = @transform_0, window_bounds = array<i64: 1>}, {transform_indices = @transform_1, window_bounds = array<i64: 4, 512>}, {transform_indices = @transform_2, window_bounds = array<i64: 4, 512>}]} {
    %c0 = arith.constant 0 : index
    %0 = memref.load %arg1[%c0] : memref<1xf32, #tpu.memory_space<smem>>
    %cst = arith.constant 1.000000e+00 : f32
    %1 = arith.divf %cst, %0 : f32
    %c0_0 = arith.constant 0 : index
    %c0_1 = arith.constant 0 : index
    %2 = vector.load %arg2[%c0_0, %c0_1] : memref<4x512xf32, #tpu.memory_space<vmem>>, vector<4x512xf32>
    %3 = vector.broadcast %1 : f32 to vector<4x512xf32>
    %4 = arith.mulf %2, %3 : vector<4x512xf32>
    %5 = math.roundeven %4 : vector<4x512xf32>
    %cst_2 = arith.constant 1.000000e+00 : f32
    %6 = vector.broadcast %cst_2 : f32 to vector<4x512xf32>
    %7 = arith.addf %5, %6 : vector<4x512xf32>
    %8 = tpu.bitcast %7 : vector<4x512xf32> -> vector<4x512xi32>
    %c22_i32 = arith.constant 22 : i32
    %9 = vector.broadcast %c22_i32 : i32 to vector<4x512xi32>
    %10 = arith.shrsi %8, %9 : vector<4x512xi32>
    %c1_i32 = arith.constant 1 : i32
    %11 = vector.broadcast %c1_i32 : i32 to vector<4x512xi32>
    %12 = arith.andi %10, %11 : vector<4x512xi32>
    %13 = arith.sitofp %12 : vector<4x512xi32> to vector<4x512xf32>
    %c23_i32 = arith.constant 23 : i32
    %14 = vector.broadcast %c23_i32 : i32 to vector<4x512xi32>
    %15 = arith.shrsi %8, %14 : vector<4x512xi32>
    %c23_i32_3 = arith.constant 23 : i32
    %16 = vector.broadcast %c23_i32_3 : i32 to vector<4x512xi32>
    %17 = arith.shli %15, %16 : vector<4x512xi32>
    %18 = tpu.bitcast %17 : vector<4x512xi32> -> vector<4x512xf32>
    %cst_4 = arith.constant 5.000000e-01 : f32
    %19 = vector.broadcast %cst_4 : f32 to vector<4x512xf32>
    %20 = arith.mulf %18, %19 : vector<4x512xf32>
    %21 = arith.mulf %13, %20 : vector<4x512xf32>
    %22 = arith.addf %18, %21 : vector<4x512xf32>
    %23 = math.floor %22 : vector<4x512xf32>
    %cst_5 = arith.constant 1.000000e+00 : f32
    %24 = vector.broadcast %cst_5 : f32 to vector<4x512xf32>
    %25 = arith.subf %23, %24 : vector<4x512xf32>
    %cst_6 = arith.constant 2.550000e+02 : f32
    %26 = vector.broadcast %cst_6 : f32 to vector<4x512xf32>
    %27 = arith.divf %25, %26 : vector<4x512xf32>
    %28 = math.floor %27 : vector<4x512xf32>
    %cst_7 = arith.constant 0.000000e+00 : f32
    %cst_8 = arith.constant 2.550000e+02 : f32
    %29 = vector.broadcast %cst_7 : f32 to vector<4x512xf32>
    %30 = arith.maximumf %29, %28 : vector<4x512xf32>
    %31 = vector.broadcast %cst_8 : f32 to vector<4x512xf32>
    %32 = arith.minimumf %31, %30 : vector<4x512xf32>
    %cst_9 = arith.constant 2.550000e+02 : f32
    %33 = vector.broadcast %cst_9 : f32 to vector<4x512xf32>
    %34 = arith.mulf %32, %33 : vector<4x512xf32>
    %35 = vector.broadcast %0 : f32 to vector<4x512xf32>
    %36 = arith.mulf %34, %35 : vector<4x512xf32>
    %c0_10 = arith.constant 0 : index
    %c0_11 = arith.constant 0 : index
    %37 = vector.load %arg3[%c0_10, %c0_11] : memref<4x512xf32, #tpu.memory_space<vmem>>, vector<4x512xf32>
    tpu.vector_store %arg3[%c0_10, %c0_11], %36 {strides = array<i32>} : memref<4x512xf32, #tpu.memory_space<vmem>>, vector<4x512xf32>,
    return
  }
  func.func @transform_0(%arg0: i32) -> i32 {
    %c0_i32 = arith.constant 0 : i32
    %c0_i32_0 = arith.constant 0 : i32
    return %c0_i32 : i32
  }
  func.func @transform_1(%arg0: i32) -> (i32, i32) {
    %c0_i32 = arith.constant 0 : i32
    %c0_i32_0 = arith.constant 0 : i32
    return %arg0, %c0_i32 : i32, i32
  }
  func.func @transform_2(%arg0: i32) -> (i32, i32) {
    %c0_i32 = arith.constant 0 : i32
    %c0_i32_0 = arith.constant 0 : i32
    return %arg0, %c0_i32 : i32, i32
  }
}

</mosaic_0001>

<bundles_post_ra>
// kernel: tpu_custom_call.1
= control target key start
LH: loop header
LB: loop body
LE: loop exit
PB: predicated region body
PF: predicated region fallthrough
CT: control target
= control target key end

     0   :  { %8 = vsyncpa [#allocation4], 0  ;;  %s248_s0 = inlined_call_operand.<no memory space> [shape: f32[1], index: 0, kind: input, shape index: {}]   ;;  %s249_s1 = inlined_call_operand.hbm [shape: f32[4,512], index: 1, kind: input, shape index: {}]   ;;  %s250_s2 = inlined_call_operand.hbm [shape: f32[4,512], index: 2, kind: output, shape index: {}]  }
   0x1   :  { %9 = vsyncpa [#allocation5], 0  ;;  %s197_s9 = smov [#allocation3]   ;;  %s149_s13 = scalar_lea.hbm %s249_s1, 256 }
   0x2   :  { %s18_s10 = sshll.u32 %s197_s9, 4  ;;  %p150_p0 = scmp.ne.s32.totalorder %s249_s1, %s149_s13  ;;  %s19_s10 = int_to_ptr.vmem [resolvable:$true] %s18_s10 }
   0x3   :  { %p153_p1 = scmp.lt.u32.totalorder %s149_s13, %s249_s1 }
   0x5   :  { %p155_p2 = pnand %p153_p1, %p150_p0 }
   0x7   :  { %158 = shalt.err (!%p155_p2)
}
   0x8   :  { %s159_s18 = scalar_lea.vmem %s19_s10, 256  ;;  %p164_p4 = scmp.lt.s32.totalorder %s19_s10, %s19_s10 }
   0x9   :  { %p160_p3 = scmp.ne.s32.totalorder %s19_s10, %s159_s18  ;;  %p165_p5 = scmp.lt.s32.totalorder %s159_s18, %s159_s18 }
   0xb   :  { %p166_p6 = por %p165_p5, %p164_p4 }
   0xd   :  { %p167_p7 = pnand %p166_p6, %p160_p3 }
   0xf   :  { %170 = shalt.err (!%p167_p7)
}
  0x10   :  { %21 = dma.hbm_to_vmem [thread:$0]  %s249_s1, 256, %s19_s10, [#allocation4]   ;;  %v229_v0 = vstv %s248_s0 }
  0x11   :  { %193 = dma.done.wait [#allocation4], 256  }
  0x12   :  { %194 = vsyncadd [#allocation4], 4294967040  ;;  %147 = vrcp.f32 %v229_v0  ;;  %v29_v2 = vld [vmem:[#allocation3] sm:$0xff]  ;;  %v30_v3 = vld [vmem:[#allocation3 + $0x8] sm:$0xff]  ;;  %s198_s0 = smov [#allocation6]  }
  0x13   :  { %s128_s1 = sshll.u32 %s198_s0, 4  ;;  %s129_s1 = int_to_ptr.vmem [resolvable:$true] %s128_s1 }
  0x14   :  { %s171_s24 = scalar_lea.vmem %s129_s1, 256  ;;  %p176_p9 = scmp.lt.s32.totalorder %s129_s1, %s129_s1 }
  0x15   :  { %p172_p8 = scmp.ne.s32.totalorder %s129_s1, %s171_s24  ;;  %p177_p10 = scmp.lt.s32.totalorder %s171_s24, %s171_s24 }
  0x17   :  { %p178_p11 = por %p177_p10, %p176_p9 }
  0x19   :  { %p179_p12 = pnand %p178_p11, %p172_p8 }
  0x1c   :  { %v148_v1 = vpop.eup %147 }
  0x1d   :  { %141 = vpush %v148_v1 }
  0x4e   :  { %s142_s23 = spop %141 }
  0x4f   :  { %v31_v4 = vstv %s142_s23 }
  0x50   :  { %v32_v5 = vmul.f32 %v31_v4, %v29_v2  ;;  %v33_v6 = vmul.f32 %v31_v4, %v30_v3 }
  0x52   :  { %v143_v7 = vround.rtne.f32 %v32_v5  ;;  %v144_v8 = vround.rtne.f32 %v33_v6 }
  0x54   :  { %v36_v9 = vadd.f32 1.0, %v143_v7  ;;  %v37_v10 = vadd.f32 1.0, %v144_v8 }
  0x56   :  { %v40_v11 = vcombine.high %v36_v9, %v36_v9  ;;  %v41_v12 = vcombine.high %v37_v10, %v37_v10  ;;  %v42_v13 = vshra.s32 %v36_v9, 22  ;;  %v44_v14 = vshra.s32 %v37_v10, 22 }
  0x57   :  { %v54_v15 = vshra.s32 %v36_v9, 23  ;;  %v56_v16 = vshra.s32 %v37_v10, 23 }
  0x58   :  { %v43_v17 = vshra.s32 %v40_v11, 22  ;;  %v45_v18 = vshra.s32 %v41_v12, 22  ;;  %v46_v19 = vand.u32 1, %v42_v13  ;;  %v48_v20 = vand.u32 1, %v44_v14 }
  0x59   :  { %v55_v21 = vshra.s32 %v40_v11, 23  ;;  %v57_v22 = vshra.s32 %v41_v12, 23  ;;  %v58_v23 = vshll.u32 %v54_v15, 23  ;;  %v60_v24 = vshll.u32 %v56_v16, 23 }
  0x5a   :  { %v47_v25 = vand.u32 1, %v43_v17  ;;  %v49_v26 = vand.u32 1, %v45_v18  ;;  %v50_v27 = vcvt.s32.f32 %v46_v19  ;;  %v52_v28 = vcvt.s32.f32 %v48_v20 }
  0x5b   :  { %v59_v29 = vshll.u32 %v55_v21, 23  ;;  %v61_v30 = vshll.u32 %v57_v22, 23  ;;  %v66_v31 = vmul.f32 0.5, %v58_v23  ;;  %v68_v32 = vmul.f32 0.5, %v60_v24 }
  0x5c   :  { %v51_v33 = vcvt.s32.f32 %v47_v25  ;;  %v53_v34 = vcvt.s32.f32 %v49_v26 }
  0x5d   :  { %v67_v35 = vmul.f32 0.5, %v59_v29  ;;  %v69_v36 = vmul.f32 0.5, %v61_v30  ;;  %v70_v37 = vmul.f32 %v66_v31, %v50_v27  ;;  %v72_v38 = vmul.f32 %v68_v32, %v52_v28 }
  0x5f   :  { %v71_v39 = vmul.f32 %v67_v35, %v51_v33  ;;  %v73_v40 = vmul.f32 %v69_v36, %v53_v34  ;;  %v74_v41 = vadd.f32 %v70_v37, %v58_v23  ;;  %v76_v42 = vadd.f32 %v72_v38, %v60_v24 }
  0x61   :  { %v75_v43 = vadd.f32 %v71_v39, %v59_v29  ;;  %v77_v44 = vadd.f32 %v73_v40, %v61_v30  ;;  %v78_v45 = vfloor.f32 %v74_v41  ;;  %v80_v46 = vfloor.f32 %v76_v42 }
  0x63   :  { %v79_v47 = vfloor.f32 %v75_v43  ;;  %v81_v48 = vfloor.f32 %v77_v44  ;;  %v137_v49 = vadd.f32 -1.0, %v78_v45  ;;  %v139_v50 = vadd.f32 -1.0, %v80_v46 }
  0x65   :  { %v138_v51 = vadd.f32 -1.0, %v79_v47  ;;  %v140_v52 = vadd.f32 -1.0, %v81_v48  ;;  %v87_v53 = vmul.f32 0.003921569, %v137_v49  ;;  %v89_v54 = vmul.f32 0.003921569, %v139_v50 }
  0x67   :  { %v91_v55 = vfloor.f32 %v87_v53  ;;  %v93_v56 = vfloor.f32 %v89_v54  ;;  %v88_v57 = vmul.f32 0.003921569, %v138_v51  ;;  %v90_v58 = vmul.f32 0.003921569, %v140_v52 }
  0x69   :  { %v92_v59 = vfloor.f32 %v88_v57  ;;  %v94_v60 = vfloor.f32 %v90_v58  ;;  %v95_v61 = vmax.f32 %v91_v55, 0.0  ;;  %v97_v62 = vmax.f32 %v93_v56, 0.0 }
  0x6b   :  { %v96_v63 = vmax.f32 %v92_v59, 0.0  ;;  %v98_v1 = vmax.f32 %v94_v60, 0.0  ;;  %v99_v2 = vmin.f32 %v95_v61, 255.0  ;;  %v101_v3 = vmin.f32 %v97_v62, 255.0 }
  0x6d   :  { %v100_v4 = vmin.f32 %v96_v63, 255.0  ;;  %v102_v5 = vmin.f32 %v98_v1, 255.0  ;;  %v103_v6 = vmul.f32 255.0, %v99_v2  ;;  %v105_v7 = vmul.f32 255.0, %v101_v3 }
  0x6f   :  { %v104_v8 = vmul.f32 255.0, %v100_v4  ;;  %v106_v9 = vmul.f32 255.0, %v102_v5  ;;  %v108_v10 = vmul.f32 %v103_v6, %v229_v0  ;;  %v110_v12 = vmul.f32 %v105_v7, %v229_v0 }
  0x71   :  { %v109_v11 = vmul.f32 %v104_v8, %v229_v0  ;;  %v111_v13 = vmul.f32 %v106_v9, %v229_v0 }
  0x73   :  { %v116_v14 = vcombine.low %v108_v10, %v109_v11  ;;  %v117_v15 = vcombine.low %v110_v12, %v111_v13 }
  0x75   :  { %120 = vst [vmem:[#allocation6] sm:$0xff] %v116_v14  ;;  %121 = vst [vmem:[#allocation6 + $0x8] sm:$0xff] %v117_v15 }
  0x76   :  { %182 = shalt.err (!%p179_p12)
}
  0x77   :  { %s183_s27 = scalar_lea.hbm %s250_s2, 256 }
  0x78   :  { %p184_p13 = scmp.ne.s32.totalorder %s250_s2, %s183_s27  ;;  %p187_p0 = scmp.lt.u32.totalorder %s183_s27, %s250_s2 }
  0x7a   :  { %p189_p1 = pnand %p187_p0, %p184_p13 }
  0x7c   :  { %192 = shalt.err (!%p189_p1)
}
  0x7d   :  { %131 = dma.vmem_to_hbm [thread:$0]  %s129_s1, 256, %s250_s2, [#allocation5]  }
  0x7e   :  { %195 = dma.done.wait [#allocation5], 256  }
  0x7f   :  { %196 = vsyncadd [#allocation5], 4294967040 }
  0x80   :  { %135 = vsyncpa [#allocation4], 1 }
  0x81   :  { %136 = vsyncpa [#allocation5], 1 }

</bundles_post_ra>
